<compile_context>
chip_gen: v7x
topology: tpu7x:2x2x1
jax: 0.10.0
libtpu: 0.0.40
codegen_flags: <defaults>
</compile_context>

<pallas_src>
import functools

import jax
import jax.numpy as jnp
from jax.experimental import pallas as pl
from jax.experimental.pallas import tpu as pltpu

HIDDEN = 400
LATENT = 20


def _round_up(x, m):
    return (x + m - 1) // m * m


def _cdiv(a, b):
    return (a + b - 1) // b


def _vae_kernel(x_ref, eps_ref, w1_ref, wh_ref, w3_ref, w4_ref, b_ref,
                recon_ref, muvar_ref, *, l_pad, d_pad):
    # Packed biases (f32), one (8, H_PAD) buffer:
    #   row 0: b1   (hidden)
    #   row 1: b21 | b22 packed at lanes [0:l_pad) and [l_pad:2*l_pad)
    #   row 2: b3   (hidden)
    #   row 3: b4   (input)
    b1 = b_ref[0:1, :]
    bh = b_ref[1:2, :2 * l_pad]
    b3 = b_ref[2:3, :]
    b4 = b_ref[3:4, :d_pad]

    x = x_ref[...]                                   # bf16 already

    # ---- encode ----
    h1 = jnp.dot(x, w1_ref[...], preferred_element_type=jnp.float32) + b1
    h1 = jnp.maximum(h1, 0.0)                        # ReLU

    # fused mu/logvar head: one wide (H, 2*L_PAD) matmul
    muvar = jnp.dot(h1.astype(jnp.bfloat16), wh_ref[...],
                    preferred_element_type=jnp.float32) + bh
    mu = muvar[:, :l_pad]                            # lane-aligned split
    logvar = muvar[:, l_pad:]

    # ---- reparameterize ----
    std = jnp.exp(0.5 * logvar)
    z = mu + eps_ref[...].astype(jnp.float32) * std  # padded lanes: mu=0, eps=0 -> z=0

    # ---- decode ----
    h3 = jnp.dot(z.astype(jnp.bfloat16), w3_ref[...],
                 preferred_element_type=jnp.float32) + b3
    h3 = jnp.maximum(h3, 0.0)                        # ReLU
    recon = jnp.tanh(jnp.dot(h3.astype(jnp.bfloat16), w4_ref[...],
                             preferred_element_type=jnp.float32) + b4)

    recon_ref[...] = recon.astype(recon_ref.dtype)
    muvar_ref[...] = muvar


def init_params(key, input_dim):
    """f32 params matching nn.Linear default init: U(-1/sqrt(fan_in), 1/sqrt(fan_in)).
    Stored as (in_features, out_features) so y = x @ W + b (same as F.linear)."""
    def linear(k, fan_in, fan_out):
        kw, kb = jax.random.split(k)
        bound = 1.0 / jnp.sqrt(float(fan_in))
        w = jax.random.uniform(kw, (fan_in, fan_out), jnp.float32, -bound, bound)
        b = jax.random.uniform(kb, (1, fan_out), jnp.float32, -bound, bound)
        return w, b

    k1, k21, k22, k3, k4 = jax.random.split(key, 5)
    p = {}
    p["w1"], p["b1"] = linear(k1, input_dim, HIDDEN)
    p["w21"], p["b21"] = linear(k21, HIDDEN, LATENT)
    p["w22"], p["b22"] = linear(k22, HIDDEN, LATENT)
    p["w3"], p["b3"] = linear(k3, LATENT, HIDDEN)
    p["w4"], p["b4"] = linear(k4, HIDDEN, input_dim)
    return p


def pack_params(p, input_dim):
    """Pad feature dims, fuse the mu/logvar head, pack biases, cast weights to bf16.
    The fc1 contraction dim is kept narrow (rounded to 16, NOT padded to 128)."""
    d_in = _round_up(input_dim, 16)                    # fc1 contraction width
    d_pad = _round_up(max(input_dim, 128), 128)        # recon lane width (lane-dense)
    h_pad = _round_up(HIDDEN, 128)
    l_pad = _round_up(max(LATENT, 128), 128)

    def pad2(a, r, c):
        return jnp.zeros((r, c), a.dtype).at[:a.shape[0], :a.shape[1]].set(a)

    w1 = pad2(p["w1"], d_in, h_pad).astype(jnp.bfloat16)
    w21 = pad2(p["w21"], h_pad, l_pad)
    w22 = pad2(p["w22"], h_pad, l_pad)
    wh = jnp.concatenate([w21, w22], axis=1).astype(jnp.bfloat16)   # (h_pad, 2*l_pad)
    w3 = pad2(p["w3"], l_pad, h_pad).astype(jnp.bfloat16)
    w4 = pad2(p["w4"], h_pad, d_pad).astype(jnp.bfloat16)

    b_all = jnp.zeros((8, h_pad), jnp.float32)
    b_all = b_all.at[0, :HIDDEN].set(p["b1"][0])
    b_all = b_all.at[1, :LATENT].set(p["b21"][0])
    b_all = b_all.at[1, l_pad:l_pad + LATENT].set(p["b22"][0])
    b_all = b_all.at[2, :HIDDEN].set(p["b3"][0])
    b_all = b_all.at[3, :input_dim].set(p["b4"][0])

    return dict(w1=w1, wh=wh, w3=w3, w4=w4, b=b_all,
                d_in=d_in, d_pad=d_pad, h_pad=h_pad, l_pad=l_pad)


def _choose_batch_tiling(B, max_tile=1024):
    """Pick (tile_b, num_tiles) so per-step overhead is amortized (big tiles),
    padding waste is bounded, and large batches yield an even number of grid
    steps so v7x's two TensorCores both get work."""
    num_tiles = max(1, _cdiv(B, max_tile))
    if B >= 2 * 512:                       # big enough to split without tiny tiles
        num_tiles = max(num_tiles, 2)
        num_tiles += num_tiles % 2         # even step count for 2 TCs
    tile_b = _round_up(_cdiv(B, num_tiles), 16)
    return tile_b, num_tiles


def vae_forward(x, eps, packed):
    B, input_dim = x.shape
    d_in, d_pad, h_pad, l_pad = (packed["d_in"], packed["d_pad"],
                                 packed["h_pad"], packed["l_pad"])

    tile_b, num_tiles = _choose_batch_tiling(B)
    b_pad = tile_b * num_tiles

    # bf16 activation streams (cast was happening in-kernel anyway); batch padding
    # waste is < 16 rows per tile by construction.
    xp = jnp.zeros((b_pad, d_in), jnp.bfloat16).at[:B, :input_dim].set(
        x.astype(jnp.bfloat16))
    ep = jnp.zeros((b_pad, l_pad), jnp.bfloat16).at[:B, :LATENT].set(
        eps.astype(jnp.bfloat16))

    kernel = functools.partial(_vae_kernel, l_pad=l_pad, d_pad=d_pad)

    recon_p, muvar_p = pl.pallas_call(
        kernel,
        out_shape=(
            jax.ShapeDtypeStruct((b_pad, d_pad), jnp.bfloat16),      # padded recon
            jax.ShapeDtypeStruct((b_pad, 2 * l_pad), jnp.float32),   # packed mu|logvar
        ),
        grid=(num_tiles,),
        in_specs=[
            pl.BlockSpec((tile_b, d_in), lambda i: (i, 0)),          # x (narrow K)
            pl.BlockSpec((tile_b, l_pad), lambda i: (i, 0)),         # eps
            pl.BlockSpec((d_in, h_pad), lambda i: (0, 0)),           # w1 (resident)
            pl.BlockSpec((h_pad, 2 * l_pad), lambda i: (0, 0)),      # fused mu/logvar head
            pl.BlockSpec((l_pad, h_pad), lambda i: (0, 0)),          # w3
            pl.BlockSpec((h_pad, d_pad), lambda i: (0, 0)),          # w4
            pl.BlockSpec((8, h_pad), lambda i: (0, 0)),              # packed biases
        ],
        out_specs=(
            pl.BlockSpec((tile_b, d_pad), lambda i: (i, 0)),
            pl.BlockSpec((tile_b, 2 * l_pad), lambda i: (i, 0)),
        ),
        compiler_params=pltpu.CompilerParams(
            dimension_semantics=("parallel",)),
    )(xp, ep, packed["w1"], packed["wh"], packed["w3"], packed["w4"], packed["b"])

    recon = recon_p[:B, :input_dim].astype(jnp.float32)
    mu = muvar_p[:B, :LATENT]
    logvar = muvar_p[:B, l_pad:l_pad + LATENT]
    return recon, mu, logvar


def vae_reference(x, eps, p):
    """Pure-JAX f32 reference for correctness checking."""
    h1 = jnp.maximum(x @ p["w1"] + p["b1"], 0.0)
    mu = h1 @ p["w21"] + p["b21"]
    logvar = h1 @ p["w22"] + p["b22"]
    std = jnp.exp(0.5 * logvar)
    z = mu + eps * std
    h3 = jnp.maximum(z @ p["w3"] + p["b3"], 0.0)
    recon = jnp.tanh(h3 @ p["w4"] + p["b4"])
    return recon, mu, logvar


if __name__ == "__main__":
    B = 8
    INPUT_DIM = 32

    key = jax.random.PRNGKey(0)
    kx, keps, kp = jax.random.split(key, 3)

    x = jax.random.normal(kx, (B, INPUT_DIM), jnp.float32)
    eps = jax.random.normal(keps, (B, LATENT), jnp.float32)  # reparameterization noise
    params = init_params(kp, INPUT_DIM)
    packed = pack_params(params, INPUT_DIM)

    recon, mu, logvar = vae_forward(x, eps, packed)
    recon, mu, logvar = jax.block_until_ready((recon, mu, logvar))

    # Sanity check vs. pure-JAX f32 reference.
    # mu/logvar (no eps/output-dtype error) checked tighter; recon (bf16 weights +
    # bf16 eps + bf16 output) checked looser.
    r_ref, mu_ref, lv_ref = vae_reference(x, eps, params)
    assert jnp.allclose(mu, mu_ref, atol=3e-2, rtol=3e-2), \
        float(jnp.max(jnp.abs(mu - mu_ref)))
    assert jnp.allclose(logvar, lv_ref, atol=3e-2, rtol=3e-2), \
        float(jnp.max(jnp.abs(logvar - lv_ref)))
    assert jnp.allclose(recon, r_ref, atol=5e-2, rtol=5e-2), \
        float(jnp.max(jnp.abs(recon - r_ref)))

    print("KERNEL_OK")
</pallas_src>

<mosaic_0001>
module attributes {stable_mosaic.version = 11 : i64} {
  func.func @_vae_kernel(%arg0: i32, %arg1: memref<16x32xbf16, #tpu.memory_space<vmem>>, %arg2: memref<16x128xbf16, #tpu.memory_space<vmem>>, %arg3: memref<32x512xbf16, #tpu.memory_space<vmem>>, %arg4: memref<512x256xbf16, #tpu.memory_space<vmem>>, %arg5: memref<128x512xbf16, #tpu.memory_space<vmem>>, %arg6: memref<512x128xbf16, #tpu.memory_space<vmem>>, %arg7: memref<8x512xf32, #tpu.memory_space<vmem>>, %arg8: memref<16x128xbf16, #tpu.memory_space<vmem>>, %arg9: memref<16x256xf32, #tpu.memory_space<vmem>>) attributes {dimension_semantics = [#tpu.dimension_semantics<parallel>], iteration_bounds = array<i64: 1>, scalar_prefetch = 0 : i64, scratch_operands = 0 : i64, tpu.core_type = #tpu.core_type<tc>, window_params = [{transform_indices = @transform_0, window_bounds = array<i64: 16, 32>}, {transform_indices = @transform_1, window_bounds = array<i64: 16, 128>}, {pipeline_mode = #tpu.pipeline_mode<synchronous>, transform_indices = @transform_2, window_bounds = array<i64: 32, 512>}, {pipeline_mode = #tpu.pipeline_mode<synchronous>, transform_indices = @transform_3, window_bounds = array<i64: 512, 256>}, {pipeline_mode = #tpu.pipeline_mode<synchronous>, transform_indices = @transform_4, window_bounds = array<i64: 128, 512>}, {pipeline_mode = #tpu.pipeline_mode<synchronous>, transform_indices = @transform_5, window_bounds = array<i64: 512, 128>}, {pipeline_mode = #tpu.pipeline_mode<synchronous>, transform_indices = @transform_6, window_bounds = array<i64: 8, 512>}, {transform_indices = @transform_7, window_bounds = array<i64: 16, 128>}, {transform_indices = @transform_8, window_bounds = array<i64: 16, 256>}]} {
    %c0 = arith.constant 0 : index
    %c0_0 = arith.constant 0 : index
    %0 = vector.load %arg7[%c0, %c0_0] : memref<8x512xf32, #tpu.memory_space<vmem>>, vector<1x512xf32>
    %c1 = arith.constant 1 : index
    %c0_1 = arith.constant 0 : index
    %1 = vector.load %arg7[%c1, %c0_1] : memref<8x512xf32, #tpu.memory_space<vmem>>, vector<1x256xf32>
    %c2 = arith.constant 2 : index
    %c0_2 = arith.constant 0 : index
    %2 = vector.load %arg7[%c2, %c0_2] : memref<8x512xf32, #tpu.memory_space<vmem>>, vector<1x512xf32>
    %c3 = arith.constant 3 : index
    %c0_3 = arith.constant 0 : index
    %3 = vector.load %arg7[%c3, %c0_3] : memref<8x512xf32, #tpu.memory_space<vmem>>, vector<1x128xf32>
    %c0_4 = arith.constant 0 : index
    %c0_5 = arith.constant 0 : index
    %4 = vector.load %arg1[%c0_4, %c0_5] : memref<16x32xbf16, #tpu.memory_space<vmem>>, vector<16x32xbf16>
    %c0_6 = arith.constant 0 : index
    %c0_7 = arith.constant 0 : index
    %5 = vector.load %arg3[%c0_6, %c0_7] : memref<32x512xbf16, #tpu.memory_space<vmem>>, vector<32x512xbf16>
    %cst = arith.constant dense<0.000000e+00> : vector<16x512xf32>
    %6 = tpu.matmul %4, %5, %cst {dimension_numbers = #tpu.dot_dimension_numbers<[1], [0], [0], [1], [0, 0, 1, 1], [], []>} : vector<16x32xbf16>, vector<32x512xbf16>, vector<16x512xf32> -> vector<16x512xf32>
    %7 = vector.broadcast %0 : vector<1x512xf32> to vector<16x512xf32>
    %8 = arith.addf %6, %7 : vector<16x512xf32>
    %cst_8 = arith.constant 0.000000e+00 : f32
    %9 = vector.broadcast %cst_8 : f32 to vector<16x512xf32>
    %10 = arith.maximumf %8, %9 : vector<16x512xf32>
    %11 = arith.truncf %10 : vector<16x512xf32> to vector<16x512xbf16>
    %c0_9 = arith.constant 0 : index
    %c0_10 = arith.constant 0 : index
    %12 = vector.load %arg4[%c0_9, %c0_10] : memref<512x256xbf16, #tpu.memory_space<vmem>>, vector<512x256xbf16>
    %cst_11 = arith.constant dense<0.000000e+00> : vector<16x256xf32>
    %13 = tpu.matmul %11, %12, %cst_11 {dimension_numbers = #tpu.dot_dimension_numbers<[1], [0], [0], [1], [0, 0, 1, 1], [], []>} : vector<16x512xbf16>, vector<512x256xbf16>, vector<16x256xf32> -> vector<16x256xf32>
    %14 = vector.broadcast %1 : vector<1x256xf32> to vector<16x256xf32>
    %15 = arith.addf %13, %14 : vector<16x256xf32>
    %16 = vector.extract_strided_slice %15 {offsets = [0, 0], sizes = [16, 128], strides = [1, 1]} : vector<16x256xf32> to vector<16x128xf32>
    %17 = vector.extract_strided_slice %15 {offsets = [0, 128], sizes = [16, 128], strides = [1, 1]} : vector<16x256xf32> to vector<16x128xf32>
    %cst_12 = arith.constant 5.000000e-01 : f32
    %18 = vector.broadcast %cst_12 : f32 to vector<16x128xf32>
    %19 = arith.mulf %18, %17 : vector<16x128xf32>
    %20 = math.exp %19 : vector<16x128xf32>
    %c0_13 = arith.constant 0 : index
    %c0_14 = arith.constant 0 : index
    %21 = vector.load %arg2[%c0_13, %c0_14] : memref<16x128xbf16, #tpu.memory_space<vmem>>, vector<16x128xbf16>
    %22 = arith.extf %21 : vector<16x128xbf16> to vector<16x128xf32>
    %23 = arith.mulf %22, %20 : vector<16x128xf32>
    %24 = arith.addf %16, %23 : vector<16x128xf32>
    %25 = arith.truncf %24 : vector<16x128xf32> to vector<16x128xbf16>
    %c0_15 = arith.constant 0 : index
    %c0_16 = arith.constant 0 : index
    %26 = vector.load %arg5[%c0_15, %c0_16] : memref<128x512xbf16, #tpu.memory_space<vmem>>, vector<128x512xbf16>
    %cst_17 = arith.constant dense<0.000000e+00> : vector<16x512xf32>
    %27 = tpu.matmul %25, %26, %cst_17 {dimension_numbers = #tpu.dot_dimension_numbers<[1], [0], [0], [1], [0, 0, 1, 1], [], []>} : vector<16x128xbf16>, vector<128x512xbf16>, vector<16x512xf32> -> vector<16x512xf32>
    %28 = vector.broadcast %2 : vector<1x512xf32> to vector<16x512xf32>
    %29 = arith.addf %27, %28 : vector<16x512xf32>
    %cst_18 = arith.constant 0.000000e+00 : f32
    %30 = vector.broadcast %cst_18 : f32 to vector<16x512xf32>
    %31 = arith.maximumf %29, %30 : vector<16x512xf32>
    %32 = arith.truncf %31 : vector<16x512xf32> to vector<16x512xbf16>
    %c0_19 = arith.constant 0 : index
    %c0_20 = arith.constant 0 : index
    %33 = vector.load %arg6[%c0_19, %c0_20] : memref<512x128xbf16, #tpu.memory_space<vmem>>, vector<512x128xbf16>
    %cst_21 = arith.constant dense<0.000000e+00> : vector<16x128xf32>
    %34 = tpu.matmul %32, %33, %cst_21 {dimension_numbers = #tpu.dot_dimension_numbers<[1], [0], [0], [1], [0, 0, 1, 1], [], []>} : vector<16x512xbf16>, vector<512x128xbf16>, vector<16x128xf32> -> vector<16x128xf32>
    %35 = vector.broadcast %3 : vector<1x128xf32> to vector<16x128xf32>
    %36 = arith.addf %34, %35 : vector<16x128xf32>
    %37 = math.tanh %36 : vector<16x128xf32>
    %38 = arith.truncf %37 : vector<16x128xf32> to vector<16x128xbf16>
    %c0_22 = arith.constant 0 : index
    %c0_23 = arith.constant 0 : index
    %39 = vector.load %arg8[%c0_22, %c0_23] : memref<16x128xbf16, #tpu.memory_space<vmem>>, vector<16x128xbf16>
    tpu.vector_store %arg8[%c0_22, %c0_23], %38 {strides = array<i32>} : memref<16x128xbf16, #tpu.memory_space<vmem>>, vector<16x128xbf16>,
    %c0_24 = arith.constant 0 : index
    %c0_25 = arith.constant 0 : index
    %40 = vector.load %arg9[%c0_24, %c0_25] : memref<16x256xf32, #tpu.memory_space<vmem>>, vector<16x256xf32>
    tpu.vector_store %arg9[%c0_24, %c0_25], %15 {strides = array<i32>} : memref<16x256xf32, #tpu.memory_space<vmem>>, vector<16x256xf32>,
    return
  }
  func.func @transform_0(%arg0: i32) -> (i32, i32) {
    %c0_i32 = arith.constant 0 : i32
    %c0_i32_0 = arith.constant 0 : i32
    return %arg0, %c0_i32 : i32, i32
  }
  func.func @transform_1(%arg0: i32) -> (i32, i32) {
    %c0_i32 = arith.constant 0 : i32
    %c0_i32_0 = arith.constant 0 : i32
    return %arg0, %c0_i32 : i32, i32
  }
  func.func @transform_2(%arg0: i32) -> (i32, i32) {
    %c0_i32 = arith.constant 0 : i32
    %c0_i32_0 = arith.constant 0 : i32
    %c0_i32_1 = arith.constant 0 : i32
    return %c0_i32, %c0_i32_0 : i32, i32
  }
  func.func @transform_3(%arg0: i32) -> (i32, i32) {
    %c0_i32 = arith.constant 0 : i32
    %c0_i32_0 = arith.constant 0 : i32
    %c0_i32_1 = arith.constant 0 : i32
    return %c0_i32, %c0_i32_0 : i32, i32
  }
  func.func @transform_4(%arg0: i32) -> (i32, i32) {
    %c0_i32 = arith.constant 0 : i32
    %c0_i32_0 = arith.constant 0 : i32
    %c0_i32_1 = arith.constant 0 : i32
    return %c0_i32, %c0_i32_0 : i32, i32
  }
  func.func @transform_5(%arg0: i32) -> (i32, i32) {
    %c0_i32 = arith.constant 0 : i32
    %c0_i32_0 = arith.constant 0 : i32
    %c0_i32_1 = arith.constant 0 : i32
    return %c0_i32, %c0_i32_0 : i32, i32
  }
  func.func @transform_6(%arg0: i32) -> (i32, i32) {
    %c0_i32 = arith.constant 0 : i32
    %c0_i32_0 = arith.constant 0 : i32
    %c0_i32_1 = arith.constant 0 : i32
    return %c0_i32, %c0_i32_0 : i32, i32
  }
  func.func @transform_7(%arg0: i32) -> (i32, i32) {
    %c0_i32 = arith.constant 0 : i32
    %c0_i32_0 = arith.constant 0 : i32
    return %arg0, %c0_i32 : i32, i32
  }
  func.func @transform_8(%arg0: i32) -> (i32, i32) {
    %c0_i32 = arith.constant 0 : i32
    %c0_i32_0 = arith.constant 0 : i32
    return %arg0, %c0_i32 : i32, i32
  }
}

</mosaic_0001>

<bundles_post_ra>
// kernel: tpu_custom_call.1
= control target key start
LH: loop header
LB: loop body
LE: loop exit
PB: predicated region body
PF: predicated region fallthrough
CT: control target
= control target key end

     0   :  { %14 = vsyncpa [#allocation3], 0  ;;  %s2364_s0 = inlined_call_operand.hbm [shape: bf16[16,32], index: 0, kind: input, shape index: {}]   ;;  %s2365_s1 = inlined_call_operand.hbm [shape: bf16[16,128], index: 1, kind: input, shape index: {}]   ;;  %s2366_s2 = inlined_call_operand.hbm [shape: bf16[32,512], index: 2, kind: input, shape index: {}]   ;;  %s2367_s3 = inlined_call_operand.hbm [shape: bf16[512,256], index: 3, kind: input, shape index: {}]   ;;  %s2368_s4 = inlined_call_operand.hbm [shape: bf16[128,512], index: 4, kind: input, shape index: {}]   ;;  %s2369_s5 = inlined_call_operand.hbm [shape: bf16[512,128], index: 5, kind: input, shape index: {}]   ;;  %s2370_s6 = inlined_call_operand.hbm [shape: f32[8,512], index: 6, kind: input, shape index: {}]   ;;  %s2371_s7 = inlined_call_operand.hbm [shape: bf16[16,128], index: 7, kind: output, shape index: {0}]   ;;  %s2372_s8 = inlined_call_operand.hbm [shape: f32[16,256], index: 8, kind: output, shape index: {1}]  }
   0x1   :  { %15 = vsyncpa [#allocation6], 0 }
   0x2   :  { %16 = vsyncpa [#allocation9], 0 }
   0x3   :  { %17 = vsyncpa [#allocation12], 0 }
   0x4   :  { %18 = vsyncpa [#allocation4], 0 }
   0x5   :  { %19 = vsyncpa [#allocation16], 0  ;;  %s2132_s27 = smov [#allocation5]   ;;  %s2133_s29 = smov [#allocation8]  }
   0x6   :  { %s37_s28 = sshll.u32 %s2132_s27, 4  ;;  %s61_s30 = sshll.u32 %s2133_s29, 4  ;;  %s38_s28 = int_to_ptr.vmem [resolvable:$true] %s37_s28  ;;  %s2193_s30 = int_to_ptr.vmem [resolvable:$true] %s61_s30 }
   0x7   :  { %s1922_s11 = scalar_lea.hbm %s2365_s1, 128 }
   0x8   :  { %p1923_p0 = scmp.ne.s32.totalorder %s2365_s1, %s1922_s11  ;;  %p1926_p1 = scmp.lt.u32.totalorder %s1922_s11, %s2365_s1 }
   0xa   :  { %p1928_p2 = pnand %p1926_p1, %p1923_p0 }
   0xc   :  { %1931 = shalt.err (!%p1928_p2)
}
   0xd   :  { %s1932_s16 = scalar_lea.vmem %s38_s28, 128  ;;  %p1937_p4 = scmp.lt.s32.totalorder %s38_s28, %s38_s28 }
   0xe   :  { %p1933_p3 = scmp.ne.s32.totalorder %s38_s28, %s1932_s16  ;;  %p1938_p5 = scmp.lt.s32.totalorder %s1932_s16, %s1932_s16 }
  0x10   :  { %p1939_p6 = por %p1938_p5, %p1937_p4 }
  0x12   :  { %p1940_p7 = pnand %p1939_p6, %p1933_p3 }
  0x14   :  { %1943 = shalt.err (!%p1940_p7)
}
  0x15   :  { %s2134_s17 = smov 64   ;;  %s2135_s18 = smov 4  }
  0x16   :  { %43 = dma.hbm_to_vmem [thread:$0]  %s2365_s1, 128, %s38_s28, [#allocation6], %s2134_s17, %s2134_s17, %s2135_s18  }
  0x17   :  { %s1944_s23 = scalar_lea.hbm %s2367_s3, 8192 }
  0x18   :  { %p1945_p8 = scmp.ne.s32.totalorder %s2367_s3, %s1944_s23  ;;  %p1948_p9 = scmp.lt.u32.totalorder %s1944_s23, %s2367_s3 }
  0x1a   :  { %p1950_p10 = pnand %p1948_p9, %p1945_p8 }
  0x1c   :  { %1953 = shalt.err (!%p1950_p10)
}
  0x1d   :  { %s1954_s29 = scalar_lea.vmem %s2193_s30, 8192  ;;  %p1959_p12 = scmp.lt.s32.totalorder %s2193_s30, %s2193_s30 }
  0x1e   :  { %p1955_p11 = scmp.ne.s32.totalorder %s2193_s30, %s1954_s29  ;;  %p1960_p13 = scmp.lt.s32.totalorder %s1954_s29, %s1954_s29 }
  0x20   :  { %p1961_p0 = por %p1960_p13, %p1959_p12 }
  0x22   :  { %p1962_p1 = pnand %p1961_p0, %p1955_p11 }
  0x24   :  { %1965 = shalt.err (!%p1962_p1)
}
  0x25   :  { %s2136_s1 = smov 128   ;;  %s2137_s28 = smov 8  }
  0x26   :  { %67 = dma.hbm_to_vmem [thread:$0]  %s2367_s3, 8192, %s2193_s30, [#allocation9], %s2136_s1, %s2136_s1, %s2137_s28  }
  0x27   :  { %s2138_s11 = smov [#allocation11]   ;;  %s2139_s13 = smov [#allocation2]  }
  0x28   :  { %s85_s12 = sshll.u32 %s2138_s11, 4  ;;  %s25_s14 = sshll.u32 %s2139_s13, 4  ;;  %s86_s12 = int_to_ptr.vmem [resolvable:$true] %s85_s12  ;;  %s2227_s14 = int_to_ptr.vmem [resolvable:$true] %s25_s14 }
  0x29   :  { %s1966_s19 = scalar_lea.hbm %s2369_s5, 4096 }
  0x2a   :  { %p1967_p2 = scmp.ne.s32.totalorder %s2369_s5, %s1966_s19  ;;  %p1970_p3 = scmp.lt.u32.totalorder %s1966_s19, %s2369_s5 }
  0x2c   :  { %p1972_p4 = pnand %p1970_p3, %p1967_p2 }
  0x2e   :  { %1975 = shalt.err (!%p1972_p4)
}
  0x2f   :  { %s1976_s3 = scalar_lea.vmem %s86_s12, 4096  ;;  %p1981_p6 = scmp.lt.s32.totalorder %s86_s12, %s86_s12 }
  0x30   :  { %p1977_p5 = scmp.ne.s32.totalorder %s86_s12, %s1976_s3  ;;  %p1982_p7 = scmp.lt.s32.totalorder %s1976_s3, %s1976_s3 }
  0x32   :  { %p1983_p8 = por %p1982_p7, %p1981_p6 }
  0x34   :  { %p1984_p9 = pnand %p1983_p8, %p1977_p5 }
  0x36   :  { %1987 = shalt.err (!%p1984_p9)
}
  0x37   :  { %91 = dma.hbm_to_vmem [thread:$0]  %s2369_s5, 4096, %s86_s12, [#allocation12], %s2134_s17, %s2134_s17, %s2135_s18  }
  0x38   :  { %s1988_s27 = scalar_lea.hbm %s2364_s0, 128 }
  0x39   :  { %p1989_p10 = scmp.ne.s32.totalorder %s2364_s0, %s1988_s27  ;;  %p1992_p11 = scmp.lt.u32.totalorder %s1988_s27, %s2364_s0 }
  0x3b   :  { %p1994_p12 = pnand %p1992_p11, %p1989_p10 }
  0x3d   :  { %1997 = shalt.err (!%p1994_p12)
}
  0x3e   :  { %s1998_s10 = scalar_lea.vmem %s2227_s14, 128  ;;  %p2003_p0 = scmp.lt.s32.totalorder %s2227_s14, %s2227_s14 }
  0x3f   :  { %p1999_p13 = scmp.ne.s32.totalorder %s2227_s14, %s1998_s10  ;;  %p2004_p1 = scmp.lt.s32.totalorder %s1998_s10, %s1998_s10 }
  0x41   :  { %p2005_p2 = por %p2004_p1, %p2003_p0 }
  0x43   :  { %p2006_p3 = pnand %p2005_p2, %p1999_p13 }
  0x45   :  { %2009 = shalt.err (!%p2006_p3)
}
  0x46   :  { %31 = dma.hbm_to_vmem [thread:$0]  %s2364_s0, 128, %s2227_s14, [#allocation3], %s2134_s17, %s2134_s17, %s2135_s18  }
  0x47   :  { %s2140_s12 = smov [#allocation7]   ;;  %s2010_s19 = scalar_lea.hbm %s2366_s2, 1024 }
  0x48   :  { %s49_s13 = sshll.u32 %s2140_s12, 4  ;;  %p2011_p4 = scmp.ne.s32.totalorder %s2366_s2, %s2010_s19  ;;  %s50_s13 = int_to_ptr.vmem [resolvable:$true] %s49_s13 }
  0x49   :  { %p2014_p5 = scmp.lt.u32.totalorder %s2010_s19, %s2366_s2 }
  0x4b   :  { %p2016_p6 = pnand %p2014_p5, %p2011_p4 }
  0x4d   :  { %2019 = shalt.err (!%p2016_p6)
}
  0x4e   :  { %s2020_s3 = scalar_lea.vmem %s50_s13, 1024  ;;  %p2025_p8 = scmp.lt.s32.totalorder %s50_s13, %s50_s13 }
  0x4f   :  { %p2021_p7 = scmp.ne.s32.totalorder %s50_s13, %s2020_s3  ;;  %p2026_p9 = scmp.lt.s32.totalorder %s2020_s3, %s2020_s3 }
  0x51   :  { %p2027_p10 = por %p2026_p9, %p2025_p8 }
  0x53   :  { %p2028_p11 = pnand %p2027_p10, %p2021_p7 }
  0x55   :  { %2031 = shalt.err (!%p2028_p11)
}
  0x56   :  { %s2141_s0 = smov 256   ;;  %s2142_s14 = smov 16  }
  0x57   :  { %55 = dma.hbm_to_vmem [thread:$0]  %s2366_s2, 1024, %s50_s13, [#allocation6], %s2141_s0, %s2141_s0, %s2142_s14  }
  0x58   :  { %s2143_s25 = smov [#allocation10]   ;;  %s2144_s27 = smov [#allocation13]  }
  0x59   :  { %s73_s26 = sshll.u32 %s2143_s25, 4  ;;  %s98_s29 = sshll.u32 %s2144_s27, 4  ;;  %s74_s26 = int_to_ptr.vmem [resolvable:$true] %s73_s26  ;;  %s99_s29 = int_to_ptr.vmem [resolvable:$true] %s98_s29 }
  0x5a   :  { %s2032_s9 = scalar_lea.hbm %s2368_s4, 4096 }
  0x5b   :  { %p2033_p12 = scmp.ne.s32.totalorder %s2368_s4, %s2032_s9  ;;  %p2036_p13 = scmp.lt.u32.totalorder %s2032_s9, %s2368_s4 }
  0x5d   :  { %p2038_p0 = pnand %p2036_p13, %p2033_p12 }
  0x5f   :  { %2041 = shalt.err (!%p2038_p0)
}
  0x60   :  { %s2042_s2 = scalar_lea.vmem %s74_s26, 4096  ;;  %p2047_p2 = scmp.lt.s32.totalorder %s74_s26, %s74_s26 }
  0x61   :  { %p2043_p1 = scmp.ne.s32.totalorder %s74_s26, %s2042_s2  ;;  %p2048_p3 = scmp.lt.s32.totalorder %s2042_s2, %s2042_s2 }
  0x63   :  { %p2049_p4 = por %p2048_p3, %p2047_p2 }
  0x65   :  { %p2050_p5 = pnand %p2049_p4, %p2043_p1 }
  0x67   :  { %2053 = shalt.err (!%p2050_p5)
}
  0x68   :  { %79 = dma.hbm_to_vmem [thread:$0]  %s2368_s4, 4096, %s74_s26, [#allocation9], %s2141_s0, %s2141_s0, %s2142_s14  }
  0x69   :  { %s2054_s20 = scalar_lea.hbm %s2370_s6, 512 }
  0x6a   :  { %p2055_p6 = scmp.ne.s32.totalorder %s2370_s6, %s2054_s20  ;;  %p2058_p7 = scmp.lt.u32.totalorder %s2054_s20, %s2370_s6 }
  0x6c   :  { %p2060_p8 = pnand %p2058_p7, %p2055_p6 }
  0x6e   :  { %2063 = shalt.err (!%p2060_p8)
}
  0x6f   :  { %s2064_s30 = scalar_lea.vmem %s99_s29, 512  ;;  %p2069_p10 = scmp.lt.s32.totalorder %s99_s29, %s99_s29 }
  0x70   :  { %p2065_p9 = scmp.ne.s32.totalorder %s99_s29, %s2064_s30  ;;  %p2070_p11 = scmp.lt.s32.totalorder %s2064_s30, %s2064_s30 }
  0x72   :  { %p2071_p12 = por %p2070_p11, %p2069_p10 }
  0x74   :  { %p2072_p13 = pnand %p2071_p12, %p2065_p9 }
  0x76   :  { %2075 = shalt.err (!%p2072_p13)
}
  0x77   :  { %101 = dma.hbm_to_vmem [thread:$0]  %s2370_s6, 512, %s99_s29, [#allocation12]  }
  0x78   :  { %2120 = dma.done.wait [#allocation3], 128  }
  0x79   :  { %2121 = vsyncadd [#allocation3], 4294967168 }
  0x7a   :  { %2122 = dma.done.wait [#allocation6], 1152  }
  0x7b   :  { %2123 = vsyncadd [#allocation6], 4294966144 }
  0x7c   :  { %2124 = dma.done.wait [#allocation9], 12288  }
  0x7d   :  { %2125 = vsyncadd [#allocation9], 4294955008 }
  0x7e   :  { %2126 = dma.done.wait [#allocation12], 4608  }
  0x7f   :  { %2127 = vsyncadd [#allocation12], 4294962688  ;;  %v2145_v0 = vmov 0   ;;  %v1725_v1 = vld [vmem:[#allocation7 + $0x4] ss:$16 sps:$4 sm:$0xff]   ;;  %vm206_vm0 = vcmask 261120   ;;  %v141_v47 = vlaneseq }
  0x80   :  { %242 = vmatprep.mubr.bf16.mxu0 %v2145_v0  ;;  %285 = vmatprep.mubr.bf16.mxu1 %v2145_v0  ;;  %v1727_v2 = vld [vmem:[#allocation7] ss:$16 sps:$4 sm:$0xff]   ;;  %v1728_v3 = vld [vmem:[#allocation7 + $0x24] ss:$16 sps:$4 sm:$0xff]   ;;  %v1732_v6 = vld [vmem:[#allocation7 + $0xc] ss:$16 sps:$4 sm:$0xff]  }
  0x81   :  { %210 = vmatprep.subr.bf16.mxu0 %v1725_v1  ;;  %v1730_v4 = vld [vmem:[#allocation7 + $0x20] ss:$16 sps:$4 sm:$0xff]   ;;  %v1734_v7 = vld [vmem:[#allocation7 + $0x8] ss:$16 sps:$4 sm:$0xff]   ;;  %v1735_v8 = vld [vmem:[#allocation7 + $0x2c] ss:$16 sps:$4 sm:$0xff]   ;;  %253 = vmatprep.subr.bf16.mxu1 %v1732_v6 }
  0x82   :  { %211 = vmatpush1.bf16.msra.mxu0 %v1727_v2  ;;  %v1731_v5 = vld [vmem:[#allocation2] sm:$0xff]   ;;  %v1737_v9 = vld [vmem:[#allocation7 + $0x28] ss:$16 sps:$4 sm:$0xff]   ;;  %254 = vmatpush1.bf16.msra.mxu1 %v1734_v7  ;;  %v1740_v11 = vld [vmem:[#allocation8 + $0x4] ss:$8 sps:$4 sm:$0xff]   ;;  %v2309_v48 = vshrl.u32 %v141_v47, 7 }
  0x83   :  { %212 = vmatprep.subr.bf16.mxu0 %v1728_v3  ;;  %v1738_v10 = vld [vmem:[#allocation8] ss:$8 sps:$4 sm:$0xff]   ;;  %255 = vmatprep.subr.bf16.mxu1 %v1735_v8  ;;  %v1743_v12 = vld [vmem:[#allocation8 + $0x14] ss:$8 sps:$4 sm:$0xff]   ;;  %v1741_v13 = vld [vmem:[#allocation8 + $0x10] ss:$8 sps:$4 sm:$0xff]  }
  0x84   :  { %v1746_v14 = vld [vmem:[#allocation8 + $0x24] ss:$8 sps:$4 sm:$0xff]   ;;  %v1744_v15 = vld [vmem:[#allocation8 + $0x20] ss:$8 sps:$4 sm:$0xff]   ;;  %v1749_v16 = vld [vmem:[#allocation8 + $0x34] ss:$8 sps:$4 sm:$0xff]  }
  0x85   :  { %v1747_v17 = vld [vmem:[#allocation8 + $0x30] ss:$8 sps:$4 sm:$0xff]   ;;  %v1752_v18 = vld [vmem:[#allocation8 + $0x44] ss:$8 sps:$4 sm:$0xff]   ;;  %v1750_v19 = vld [vmem:[#allocation8 + $0x40] ss:$8 sps:$4 sm:$0xff]  }
  0x86   :  { %213 = vmatpush1.bf16.msra.mxu0 %v1730_v4  ;;  %256 = vmatpush1.bf16.msra.mxu1 %v1737_v9  ;;  %v1755_v20 = vld [vmem:[#allocation8 + $0x54] ss:$8 sps:$4 sm:$0xff]   ;;  %v1753_v21 = vld [vmem:[#allocation8 + $0x50] ss:$8 sps:$4 sm:$0xff]   ;;  %v1758_v22 = vld [vmem:[#allocation8 + $0x64] ss:$8 sps:$4 sm:$0xff]  }
  0x87   :  { %703 = vmatprep.subr.bf16.mxu0 %v1740_v11  ;;  %v1756_v23 = vld [vmem:[#allocation8 + $0x60] ss:$8 sps:$4 sm:$0xff]   ;;  %v1761_v24 = vld [vmem:[#allocation8 + $0x74] ss:$8 sps:$4 sm:$0xff]   ;;  %v1759_v25 = vld [vmem:[#allocation8 + $0x70] ss:$8 sps:$4 sm:$0xff]  }
  0x88   :  { %v1764_v26 = vld [vmem:[#allocation8 + $0x84] ss:$8 sps:$4 sm:$0xff]   ;;  %v1762_v27 = vld [vmem:[#allocation8 + $0x80] ss:$8 sps:$4 sm:$0xff]   ;;  %v1767_v28 = vld [vmem:[#allocation8 + $0x94] ss:$8 sps:$4 sm:$0xff]  }
  0x89   :  { %1514 = vmatmul.mubr.msk.bf16.vlgmr.msra.gmra.mrb[0].mxu0 %vm206_vm0, %v1731_v5  ;;  %1515 = vmatmul.mubr.msk.bf16.vlgmr.msra.gmra.mrb[0].mxu1 %vm206_vm0, %v1731_v5  ;;  %v1765_v29 = vld [vmem:[#allocation8 + $0x90] ss:$8 sps:$4 sm:$0xff]   ;;  %v1770_v30 = vld [vmem:[#allocation8 + $0xa4] ss:$8 sps:$4 sm:$0xff]   ;;  %v1768_v31 = vld [vmem:[#allocation8 + $0xa0] ss:$8 sps:$4 sm:$0xff]  }
  0x8a   :  { %704 = vmatpush1.bf16.msra.mxu0 %v1738_v10  ;;  %1049 = vmatprep.mubr.bf16.mxu1 %v2145_v0  ;;  %v1773_v32 = vld [vmem:[#allocation8 + $0xb4] ss:$8 sps:$4 sm:$0xff]   ;;  %v1771_v33 = vld [vmem:[#allocation8 + $0xb0] ss:$8 sps:$4 sm:$0xff]   ;;  %v1776_v34 = vld [vmem:[#allocation8 + $0xc4] ss:$8 sps:$4 sm:$0xff]  }
  0x8b   :  { %705 = vmatprep.subr.bf16.mxu0 %v1743_v12  ;;  %v1774_v35 = vld [vmem:[#allocation8 + $0xc0] ss:$8 sps:$4 sm:$0xff]   ;;  %v1779_v36 = vld [vmem:[#allocation8 + $0xd4] ss:$8 sps:$4 sm:$0xff]   ;;  %v1777_v37 = vld [vmem:[#allocation8 + $0xd0] ss:$8 sps:$4 sm:$0xff]  }
  0x8c   :  { %v1782_v38 = vld [vmem:[#allocation8 + $0xe4] ss:$8 sps:$4 sm:$0xff]   ;;  %v1780_v39 = vld [vmem:[#allocation8 + $0xe0] ss:$8 sps:$4 sm:$0xff]   ;;  %v1785_v40 = vld [vmem:[#allocation8 + $0xf4] ss:$8 sps:$4 sm:$0xff]  }
  0x8d   :  { %v1783_v41 = vld [vmem:[#allocation8 + $0xf0] ss:$8 sps:$4 sm:$0xff]   ;;  %v1788_v42 = vld [vmem:[#allocation8 + $0x104] ss:$8 sps:$4 sm:$0xff]   ;;  %v2312_v49 = vsub.s32 0, %v2309_v48  ;;  %v2315_v51 = vsub.s32 1, %v2309_v48 }
  0x8e   :  { %706 = vmatpush1.bf16.msra.mxu0 %v1741_v13  ;;  %v1834_v43 = vld [vmem:[#allocation10] ss:$16 sps:$4 sm:$0xff]   ;;  %v1836_v44 = vld [vmem:[#allocation10 + $0x4] ss:$16 sps:$4 sm:$0xff]   ;;  %v151_v53 = vsub.s32 2, %v2309_v48  ;;  %v155_v55 = vsub.s32 3, %v2309_v48 }
  0x8f   :  { %707 = vmatprep.subr.bf16.mxu0 %v1746_v14  ;;  %v1839_v45 = vld [vmem:[#allocation10 + $0x24] ss:$16 sps:$4 sm:$0xff]   ;;  %1017 = vmatprep.subr.bf16.mxu1 %v1836_v44  ;;  %v1837_v46 = vld [vmem:[#allocation10 + $0x20] ss:$16 sps:$4 sm:$0xff]   ;;  %s2146_s6 = smov [#allocation15]  }
  0x90   :  { %1018 = vmatpush1.bf16.msra.mxu1 %v1834_v43  ;;  %v124_v50 = vld [vmem:[#allocation13] ss:$8 sm:$0xf]  ;;  %v1821_v44 = vld [vmem:[#allocation8 + $0x1b4] ss:$8 sps:$4 sm:$0xff]   ;;  %s1486_s25 = sshll.u32 %s2146_s6, 4  ;;  %s1487_s25 = int_to_ptr.vmem [resolvable:$true] %s1486_s25 }
  0x91   :  { %1019 = vmatprep.subr.bf16.mxu1 %v1839_v45  ;;  %v144_v52 = vrot.slane %v124_v50, %v2312_v49  ;;  %v148_v54 = vrot.slane %v124_v50, %v2315_v51  ;;  %v152_v59 = vrot.slane %v124_v50, %v151_v53  ;;  %v156_v62 = vrot.slane %v124_v50, %v155_v55  ;;  %v1816_v43 = vld [vmem:[#allocation8 + $0x1a0] ss:$8 sps:$4 sm:$0xff]   ;;  %v1819_v45 = vld [vmem:[#allocation8 + $0x1b0] ss:$8 sps:$4 sm:$0xff]   ;;  %v1827_v50 = vld [vmem:[#allocation8 + $0x1d4] ss:$8 sps:$4 sm:$0xff]   ;;  %p2081_p1 = scmp.lt.s32.totalorder %s1487_s25, %s1487_s25 }
  0x92   :  { %708 = vmatpush1.bf16.msra.mxu0 %v1744_v15  ;;  %v1822_v47 = vld [vmem:[#allocation8 + $0x1c0] ss:$8 sps:$4 sm:$0xff]   ;;  %s2076_s26 = scalar_lea.vmem %s1487_s25, 512 }
  0x93   :  { %709 = vmatprep.subr.bf16.mxu0 %v1749_v16  ;;  %p2077_p0 = scmp.ne.s32.totalorder %s1487_s25, %s2076_s26  ;;  %p2082_p2 = scmp.lt.s32.totalorder %s2076_s26, %s2076_s26 }
  0x94   :  { %1020 = vmatpush1.bf16.msra.mxu1 %v1837_v46  ;;  %v1824_v46 = vld [vmem:[#allocation8 + $0x1c4] ss:$8 sps:$4 sm:$0xff]  }
  0x95   :  { %p2083_p3 = por %p2082_p2, %p2081_p1 }
  0x96   :  { %710 = vmatpush1.bf16.msra.mxu0 %v1747_v17  ;;  %v1786_v17 = vld [vmem:[#allocation8 + $0x100] ss:$8 sps:$4 sm:$0xff]  }
  0x97   :  { %711 = vmatprep.subr.bf16.mxu0 %v1752_v18  ;;  %p2084_p4 = pnand %p2083_p3, %p2077_p0 }
  0x9a   :  { %712 = vmatpush1.bf16.msra.mxu0 %v1750_v19 }
  0x9b   :  { %713 = vmatprep.subr.bf16.mxu0 %v1755_v20  ;;  %v1791_v20 = vld [vmem:[#allocation8 + $0x114] ss:$8 sps:$4 sm:$0xff]  }
  0x9e   :  { %714 = vmatpush1.bf16.msra.mxu0 %v1753_v21 }
  0x9f   :  { %715 = vmatprep.subr.bf16.mxu0 %v1758_v22 }
  0xa2   :  { %716 = vmatpush1.bf16.msra.mxu0 %v1756_v23 }
  0xa3   :  { %717 = vmatprep.subr.bf16.mxu0 %v1761_v24  ;;  %v1789_v24 = vld [vmem:[#allocation8 + $0x110] ss:$8 sps:$4 sm:$0xff]  }
  0xa6   :  { %718 = vmatpush1.bf16.msra.mxu0 %v1759_v25 }
  0xa7   :  { %719 = vmatprep.subr.bf16.mxu0 %v1764_v26  ;;  %v1794_v26 = vld [vmem:[#allocation8 + $0x124] ss:$8 sps:$4 sm:$0xff]  }
  0xaa   :  { %720 = vmatpush1.bf16.msra.mxu0 %v1762_v27  ;;  %v1792_v27 = vld [vmem:[#allocation8 + $0x120] ss:$8 sps:$4 sm:$0xff]  }
  0xab   :  { %721 = vmatprep.subr.bf16.mxu0 %v1767_v28  ;;  %v1797_v28 = vld [vmem:[#allocation8 + $0x134] ss:$8 sps:$4 sm:$0xff]  }
  0xae   :  { %722 = vmatpush1.bf16.msra.mxu0 %v1765_v29  ;;  %v1795_v29 = vld [vmem:[#allocation8 + $0x130] ss:$8 sps:$4 sm:$0xff]  }
  0xaf   :  { %723 = vmatprep.subr.bf16.mxu0 %v1770_v30  ;;  %v1800_v30 = vld [vmem:[#allocation8 + $0x144] ss:$8 sps:$4 sm:$0xff]  }
  0xb2   :  { %724 = vmatpush1.bf16.msra.mxu0 %v1768_v31  ;;  %v1798_v31 = vld [vmem:[#allocation8 + $0x140] ss:$8 sps:$4 sm:$0xff]  }
  0xb3   :  { %725 = vmatprep.subr.bf16.mxu0 %v1773_v32  ;;  %v1803_v32 = vld [vmem:[#allocation8 + $0x154] ss:$8 sps:$4 sm:$0xff]  }
  0xb6   :  { %726 = vmatpush1.bf16.msra.mxu0 %v1771_v33  ;;  %v1801_v33 = vld [vmem:[#allocation8 + $0x150] ss:$8 sps:$4 sm:$0xff]  }
  0xb7   :  { %727 = vmatprep.subr.bf16.mxu0 %v1776_v34  ;;  %v1806_v34 = vld [vmem:[#allocation8 + $0x164] ss:$8 sps:$4 sm:$0xff]  }
  0xba   :  { %728 = vmatpush1.bf16.msra.mxu0 %v1774_v35  ;;  %v1804_v35 = vld [vmem:[#allocation8 + $0x160] ss:$8 sps:$4 sm:$0xff]  }
  0xbb   :  { %729 = vmatprep.subr.bf16.mxu0 %v1779_v36  ;;  %v1809_v36 = vld [vmem:[#allocation8 + $0x174] ss:$8 sps:$4 sm:$0xff]  }
  0xbe   :  { %730 = vmatpush1.bf16.msra.mxu0 %v1777_v37  ;;  %v1807_v37 = vld [vmem:[#allocation8 + $0x170] ss:$8 sps:$4 sm:$0xff]  }
  0xbf   :  { %731 = vmatprep.subr.bf16.mxu0 %v1782_v38  ;;  %v1812_v38 = vld [vmem:[#allocation8 + $0x184] ss:$8 sps:$4 sm:$0xff]  }
  0xc2   :  { %732 = vmatpush1.bf16.msra.mxu0 %v1780_v39  ;;  %v1810_v39 = vld [vmem:[#allocation8 + $0x180] ss:$8 sps:$4 sm:$0xff]  }
  0xc3   :  { %733 = vmatprep.subr.bf16.mxu0 %v1785_v40  ;;  %v1815_v40 = vld [vmem:[#allocation8 + $0x194] ss:$8 sps:$4 sm:$0xff]  }
  0xc6   :  { %734 = vmatpush1.bf16.msra.mxu0 %v1783_v41  ;;  %v1813_v41 = vld [vmem:[#allocation8 + $0x190] ss:$8 sps:$4 sm:$0xff]  }
  0xc7   :  { %746 = vmatprep.subr.bf16.mxu0 %v1788_v42  ;;  %v1818_v42 = vld [vmem:[#allocation8 + $0x1a4] ss:$8 sps:$4 sm:$0xff]  }
 0x15c   :  { %v244_v56 = vpop.f32.mrb[0].mxu0  ;;  %v287_v3 = vpop.f32.mrb[0].mxu1 }
 0x15d   :  { %v245_v57 = vadd.f32 %v244_v56, %v144_v52  ;;  %v246_v58 = vpop.f32.mrb[1].mxu0  ;;  %v288_v6 = vadd.f32 %v287_v3, %v152_v59  ;;  %v289_v7 = vpop.f32.mrb[1].mxu1  ;;  %v1828_v56 = vld [vmem:[#allocation8 + $0x1e0] ss:$8 sps:$4 sm:$0xff]  }
 0x15e   :  { %v247_v60 = vadd.f32 %v246_v58, %v148_v54  ;;  %v248_v61 = vpop.f32.mrb[2].mxu0  ;;  %v290_v10 = vadd.f32 %v289_v7, %v156_v62  ;;  %v291_v11 = vpop.f32.mrb[2].mxu1  ;;  %v1831_v58 = vld [vmem:[#allocation8 + $0x1f0] ss:$8 sps:$4 sm:$0xff]  }
 0x15f   :  { %v249_v63 = vadd.f32 %v248_v61, %v144_v52  ;;  %v250_v1 = vpop.f32.mrb[3].mxu0  ;;  %v296_v4 = vmax.f32 %v245_v57, 0.0  ;;  %v298_v13 = vmax.f32 %v288_v6, 0.0  ;;  %v292_v14 = vadd.f32 %v291_v11, %v152_v59  ;;  %v293_v15 = vpop.f32.mrb[3].mxu1  ;;  %v1825_v52 = vld [vmem:[#allocation8 + $0x1d0] ss:$8 sps:$4 sm:$0xff]  }
 0x160   :  { %v251_v2 = vadd.f32 %v250_v1, %v148_v54  ;;  %v297_v8 = vmax.f32 %v247_v60, 0.0  ;;  %v299_v18 = vmax.f32 %v290_v10, 0.0  ;;  %v294_v19 = vadd.f32 %v293_v15, %v156_v62  ;;  %v1830_v54 = vld [vmem:[#allocation8 + $0x1e4] ss:$8 sps:$4 sm:$0xff]   ;;  %v1833_v57 = vld [vmem:[#allocation8 + $0x1f4] ss:$8 sps:$4 sm:$0xff]  }
 0x161   :  { %v300_v5 = vmax.f32 %v249_v63, 0.0  ;;  %v302_v21 = vmax.f32 %v292_v14, 0.0  ;;  %v1842_v59 = vld [vmem:[#allocation10 + $0x44] ss:$16 sps:$4 sm:$0xff]   ;;  %v1840_v60 = vld [vmem:[#allocation10 + $0x40] ss:$16 sps:$4 sm:$0xff]  }
 0x162   :  { %v301_v9 = vmax.f32 %v251_v2, 0.0  ;;  %v303_v22 = vmax.f32 %v294_v19, 0.0  ;;  %1021 = vmatprep.subr.bf16.mxu1 %v1842_v59  ;;  %v1845_v61 = vld [vmem:[#allocation10 + $0x64] ss:$16 sps:$4 sm:$0xff]   ;;  %v1843_v62 = vld [vmem:[#allocation10 + $0x60] ss:$16 sps:$4 sm:$0xff]  }
 0x163   :  { %v304_v12 = vpack.c.bf16 %v300_v5, %v296_v4  ;;  %v306_v23 = vpack.c.bf16 %v302_v21, %v298_v13  ;;  %1022 = vmatpush1.bf16.msra.mxu1 %v1840_v60  ;;  %v1848_v63 = vld [vmem:[#allocation10 + $0x84] ss:$16 sps:$4 sm:$0xff]   ;;  %v1846_v1 = vld [vmem:[#allocation10 + $0x80] ss:$16 sps:$4 sm:$0xff]   ;;  %v1888_v59 = vld [vmem:[#allocation11 + $0x58] sm:$0xff]  }
 0x164   :  { %v305_v16 = vpack.c.bf16 %v301_v9, %v297_v8  ;;  %v307_v25 = vpack.c.bf16 %v303_v22, %v299_v18  ;;  %1023 = vmatprep.subr.bf16.mxu1 %v1845_v61  ;;  %v1851_v2 = vld [vmem:[#allocation10 + $0xa4] ss:$16 sps:$4 sm:$0xff]   ;;  %v1849_v3 = vld [vmem:[#allocation10 + $0xa0] ss:$16 sps:$4 sm:$0xff]   ;;  %v1860_v8 = vld [vmem:[#allocation10 + $0xc] ss:$16 sps:$4 sm:$0xff]  }
 0x165   :  { %v1854_v4 = vld [vmem:[#allocation10 + $0xc4] ss:$16 sps:$4 sm:$0xff]   ;;  %v1852_v5 = vld [vmem:[#allocation10 + $0xc0] ss:$16 sps:$4 sm:$0xff]   ;;  %v1889_v60 = vld [vmem:[#allocation11 + $0x18] sm:$0xff]  }
 0x166   :  { %735 = vmatprep.mubr.bf16.mxu0 %v305_v16  ;;  %v1857_v6 = vld [vmem:[#allocation10 + $0xe4] ss:$16 sps:$4 sm:$0xff]   ;;  %v1855_v7 = vld [vmem:[#allocation10 + $0xe0] ss:$16 sps:$4 sm:$0xff]  }
 0x167   :  { %736 = vmatmul.mubr.bf16.vlgmr.msra.gmra.mrb[4].mxu0 %v304_v12  ;;  %1024 = vmatpush1.bf16.msra.mxu1 %v1843_v62  ;;  %v126_v9 = vld [vmem:[#allocation13 + $0x1] ss:$8 sm:$0x3] }
 0x168   :  { %747 = vmatpush1.bf16.msra.mxu0 %v1786_v17  ;;  %778 = vmatprep.mubr.bf16.mxu0 %v307_v25  ;;  %v376_v10 = vrot.slane %v126_v9, %v2312_v49  ;;  %v380_v11 = vrot.slane %v126_v9, %v2315_v51  ;;  %v1890_v61 = vld [vmem:[#allocation11 + $0x60] sm:$0xff]  }
 0x169   :  { %748 = vmatprep.subr.bf16.mxu0 %v1791_v20  ;;  %1025 = vmatprep.subr.bf16.mxu1 %v1848_v63  ;;  %v1891_v62 = vld [vmem:[#allocation11 + $0x20] sm:$0xff]   ;;  %v1892_v63 = vld [vmem:[#allocation11 + $0x68] sm:$0xff]  }
 0x16b   :  { %1026 = vmatpush1.bf16.msra.mxu1 %v1846_v1  ;;  %v1893_v1 = vld [vmem:[#allocation11 + $0x28] sm:$0xff]  }
 0x16c   :  { %749 = vmatpush1.bf16.msra.mxu0 %v1789_v24  ;;  %1027 = vmatprep.subr.bf16.mxu1 %v1851_v2  ;;  %v1649_v24 = vld [vmem:[#allocation5] sm:$0xff]   ;;  %v1894_v2 = vld [vmem:[#allocation11 + $0x70] sm:$0xff]  }
 0x16d   :  { %750 = vmatprep.subr.bf16.mxu0 %v1794_v26  ;;  %v1650_v25 = vunpack.c.l.bf16 %v1649_v24  ;;  %v1651_v26 = vunpack.c.h.bf16 %v1649_v24  ;;  %v1899_v24 = vld [vmem:[#allocation11 + $0x80] sm:$0xff]  }
 0x16f   :  { %1028 = vmatpush1.bf16.msra.mxu1 %v1849_v3  ;;  %v1895_v3 = vld [vmem:[#allocation11 + $0x30] sm:$0xff]  }
 0x170   :  { %751 = vmatpush1.bf16.msra.mxu0 %v1792_v27  ;;  %1029 = vmatprep.subr.bf16.mxu1 %v1854_v4  ;;  %v1896_v4 = vld [vmem:[#allocation11 + $0x78] sm:$0xff]  }
 0x171   :  { %752 = vmatprep.subr.bf16.mxu0 %v1797_v28 }
 0x173   :  { %1030 = vmatpush1.bf16.msra.mxu1 %v1852_v5  ;;  %v1897_v5 = vld [vmem:[#allocation11 + $0x38] sm:$0xff]  }
 0x174   :  { %753 = vmatpush1.bf16.msra.mxu0 %v1795_v29  ;;  %1031 = vmatprep.subr.bf16.mxu1 %v1857_v6  ;;  %v1898_v6 = vld [vmem:[#allocation11 + $0xc0] sm:$0xff]  }
 0x175   :  { %754 = vmatprep.subr.bf16.mxu0 %v1800_v30 }
 0x177   :  { %1032 = vmatpush1.bf16.msra.mxu1 %v1855_v7  ;;  %v128_v7 = vld [vmem:[#allocation13 + $0x2] ss:$8 sm:$0xf] }
 0x178   :  { %755 = vmatpush1.bf16.msra.mxu0 %v1798_v31  ;;  %1060 = vmatprep.subr.bf16.mxu1 %v1860_v8  ;;  %v840_v8 = vrot.slane %v128_v7, %v2312_v49  ;;  %v844_v9 = vrot.slane %v128_v7, %v2315_v51  ;;  %v1901_v49 = vld [vmem:[#allocation11 + $0x88] sm:$0xff]   ;;  %v1902_v51 = vld [vmem:[#allocation11 + $0xd0] sm:$0xff]  }
 0x179   :  { %756 = vmatprep.subr.bf16.mxu0 %v1803_v32 }
 0x17c   :  { %757 = vmatpush1.bf16.msra.mxu0 %v1801_v33  ;;  %v1858_v33 = vld [vmem:[#allocation10 + $0x8] ss:$16 sps:$4 sm:$0xff]  }
 0x17d   :  { %758 = vmatprep.subr.bf16.mxu0 %v1806_v34 }
 0x180   :  { %759 = vmatpush1.bf16.msra.mxu0 %v1804_v35  ;;  %v1863_v35 = vld [vmem:[#allocation10 + $0x2c] ss:$16 sps:$4 sm:$0xff]  }
 0x181   :  { %760 = vmatprep.subr.bf16.mxu0 %v1809_v36  ;;  %v1861_v36 = vld [vmem:[#allocation10 + $0x28] ss:$16 sps:$4 sm:$0xff]  }
 0x184   :  { %761 = vmatpush1.bf16.msra.mxu0 %v1807_v37  ;;  %v1866_v37 = vld [vmem:[#allocation10 + $0x4c] ss:$16 sps:$4 sm:$0xff]  }
 0x185   :  { %762 = vmatprep.subr.bf16.mxu0 %v1812_v38  ;;  %v1864_v38 = vld [vmem:[#allocation10 + $0x48] ss:$16 sps:$4 sm:$0xff]  }
 0x188   :  { %763 = vmatpush1.bf16.msra.mxu0 %v1810_v39  ;;  %v1869_v39 = vld [vmem:[#allocation10 + $0x6c] ss:$16 sps:$4 sm:$0xff]  }
 0x189   :  { %764 = vmatprep.subr.bf16.mxu0 %v1815_v40  ;;  %v1867_v40 = vld [vmem:[#allocation10 + $0x68] ss:$16 sps:$4 sm:$0xff]  }
 0x18c   :  { %765 = vmatpush1.bf16.msra.mxu0 %v1813_v41  ;;  %v1872_v41 = vld [vmem:[#allocation10 + $0x8c] ss:$16 sps:$4 sm:$0xff]  }
 0x18d   :  { %766 = vmatprep.subr.bf16.mxu0 %v1818_v42  ;;  %v1870_v42 = vld [vmem:[#allocation10 + $0x88] ss:$16 sps:$4 sm:$0xff]  }
 0x190   :  { %767 = vmatpush1.bf16.msra.mxu0 %v1816_v43  ;;  %v1875_v43 = vld [vmem:[#allocation10 + $0xac] ss:$16 sps:$4 sm:$0xff]  }
 0x191   :  { %768 = vmatprep.subr.bf16.mxu0 %v1821_v44  ;;  %v1873_v44 = vld [vmem:[#allocation10 + $0xa8] ss:$16 sps:$4 sm:$0xff]  }
 0x194   :  { %769 = vmatpush1.bf16.msra.mxu0 %v1819_v45  ;;  %v1878_v45 = vld [vmem:[#allocation10 + $0xcc] ss:$16 sps:$4 sm:$0xff]  }
 0x195   :  { %770 = vmatprep.subr.bf16.mxu0 %v1824_v46  ;;  %v1881_v46 = vld [vmem:[#allocation10 + $0xec] ss:$16 sps:$4 sm:$0xff]  }
 0x198   :  { %771 = vmatpush1.bf16.msra.mxu0 %v1822_v47  ;;  %v1879_v47 = vld [vmem:[#allocation10 + $0xe8] ss:$16 sps:$4 sm:$0xff]  }
 0x199   :  { %772 = vmatprep.subr.bf16.mxu0 %v1827_v50  ;;  %v1882_v50 = vld [vmem:[#allocation11 + $0x40] sm:$0xff]  }
 0x19c   :  { %773 = vmatpush1.bf16.msra.mxu0 %v1825_v52  ;;  %v1883_v52 = vld [vmem:[#allocation11] sm:$0xff]  }
 0x19d   :  { %774 = vmatprep.subr.bf16.mxu0 %v1830_v54  ;;  %v1884_v54 = vld [vmem:[#allocation11 + $0x48] sm:$0xff]  }
 0x1a0   :  { %775 = vmatpush1.bf16.msra.mxu0 %v1828_v56  ;;  %v1885_v56 = vld [vmem:[#allocation11 + $0x8] sm:$0xff]  }
 0x1a1   :  { %776 = vmatprep.subr.bf16.mxu0 %v1833_v57  ;;  %v1886_v57 = vld [vmem:[#allocation11 + $0x50] sm:$0xff]  }
 0x1a4   :  { %777 = vmatpush1.bf16.msra.mxu0 %v1831_v58  ;;  %v1887_v58 = vld [vmem:[#allocation11 + $0x10] sm:$0xff]  }
 0x1a7   :  { %779 = vmatmul.mubr.bf16.vlgmr.msra.gmra.mrb[4].mxu0 %v306_v23 }
 0x27a   :  { %v780_v12 = vpop.f32.mrb[4].mxu0 }
 0x27b   :  { %v1701_v13 = vadd.f32 %v780_v12, %v376_v10  ;;  %v782_v14 = vpop.f32.mrb[5].mxu0 }
 0x27c   :  { %v1702_v15 = vadd.f32 %v782_v14, %v380_v11  ;;  %v784_v16 = vpop.f32.mrb[6].mxu0 }
 0x27d   :  { %1465 = vst [vmem:[#allocation15] sm:$0xff] %v1701_v13  ;;  %v1703_v17 = vadd.f32 %v784_v16, %v376_v10  ;;  %v786_v18 = vpop.f32.mrb[7].mxu0 }
 0x27e   :  { %v789_v19 = vmul.f32 0.5, %v1702_v15  ;;  %1466 = vst [vmem:[#allocation15 + $0x8] sm:$0xff] %v1702_v15  ;;  %v1704_v20 = vadd.f32 %v786_v18, %v380_v11 }
 0x27f   :  { %1467 = vst [vmem:[#allocation15 + $0x10] sm:$0xff] %v1703_v17 }
 0x280   :  { %v791_v21 = vmul.f32 1.442695, %v789_v19  ;;  %v790_v22 = vmul.f32 0.5, %v1704_v20  ;;  %1468 = vst [vmem:[#allocation15 + $0x18] sm:$0xff] %v1704_v20 }
 0x282   :  { %1914 = vpow2.f32 %v791_v21  ;;  %v793_v23 = vmul.f32 1.442695, %v790_v22 }
 0x284   :  { %1916 = vpow2.f32 %v793_v23 }
 0x28c   :  { %v1915_v27 = vpop.eup %1914 }
 0x28d   :  { %v799_v28 = vmul.f32 %v1915_v27, %v1650_v25  ;;  %v1900_v25 = vld [vmem:[#allocation11 + $0xc8] sm:$0xff]   ;;  %v1904_v27 = vld [vmem:[#allocation11 + $0xd8] sm:$0xff]  }
 0x28e   :  { %v1917_v29 = vpop.eup %1916 }
 0x28f   :  { %v800_v30 = vmul.f32 %v1917_v29, %v1651_v26  ;;  %v801_v31 = vadd.f32 %v1701_v13, %v799_v28  ;;  %v1903_v26 = vld [vmem:[#allocation11 + $0x90] sm:$0xff]   ;;  %v1905_v28 = vld [vmem:[#allocation11 + $0x98] sm:$0xff]   ;;  %v1906_v29 = vld [vmem:[#allocation11 + $0xe0] sm:$0xff]  }
 0x291   :  { %v802_v32 = vadd.f32 %v1703_v17, %v800_v30  ;;  %v1907_v30 = vld [vmem:[#allocation11 + $0xa0] sm:$0xff]  }
 0x293   :  { %v803_v34 = vpack.c.bf16 %v802_v32, %v801_v31  ;;  %v1908_v31 = vld [vmem:[#allocation11 + $0xe8] sm:$0xff]  }
 0x294   :  { %v1909_v32 = vld [vmem:[#allocation11 + $0xa8] sm:$0xff]  }
 0x295   :  { %1050 = vmatmul.mubr.bf16.vlgmr.msra.gmra.mrb[4].mxu1 %v803_v34 }
 0x296   :  { %1061 = vmatpush1.bf16.msra.mxu1 %v1858_v33  ;;  %1092 = vmatprep.mubr.bf16.mxu1 %v2145_v0  ;;  %v1876_v0 = vld [vmem:[#allocation10 + $0xc8] ss:$16 sps:$4 sm:$0xff]   ;;  %v848_v33 = vrot.slane %v128_v7, %v151_v53 }
 0x297   :  { %1062 = vmatprep.subr.bf16.mxu1 %v1863_v35  ;;  %v852_v35 = vrot.slane %v128_v7, %v155_v55 }
 0x29a   :  { %1063 = vmatpush1.bf16.msra.mxu1 %v1861_v36 }
 0x29b   :  { %1064 = vmatprep.subr.bf16.mxu1 %v1866_v37  ;;  %v1911_v37 = vld [vmem:[#allocation11 + $0xb0] sm:$0xff]  }
 0x29e   :  { %1065 = vmatpush1.bf16.msra.mxu1 %v1864_v38 }
 0x29f   :  { %1066 = vmatprep.subr.bf16.mxu1 %v1869_v39 }
 0x2a2   :  { %1067 = vmatpush1.bf16.msra.mxu1 %v1867_v40  ;;  %v1912_v40 = vld [vmem:[#allocation11 + $0xf8] sm:$0xff]  }
 0x2a3   :  { %1068 = vmatprep.subr.bf16.mxu1 %v1872_v41 }
 0x2a6   :  { %1069 = vmatpush1.bf16.msra.mxu1 %v1870_v42 }
 0x2a7   :  { %1070 = vmatprep.subr.bf16.mxu1 %v1875_v43 }
 0x2aa   :  { %1071 = vmatpush1.bf16.msra.mxu1 %v1873_v44 }
 0x2ab   :  { %1072 = vmatprep.subr.bf16.mxu1 %v1878_v45 }
 0x2ae   :  { %1073 = vmatpush1.bf16.msra.mxu1 %v1876_v0  ;;  %v1913_v0 = vld [vmem:[#allocation11 + $0xb8] sm:$0xff]  }
 0x2af   :  { %1074 = vmatprep.subr.bf16.mxu1 %v1881_v46 }
 0x2b2   :  { %1075 = vmatpush1.bf16.msra.mxu1 %v1879_v47 }
 0x2b3   :  { %1657 = vmatprep.subr.bf16.mxu1 %v1882_v50 }
 0x2b5   :  { %1093 = vmatmul.mubr.bf16.vlgmr.msra.gmra.mrb[8].mxu1 %v803_v34  ;;  %v1910_v34 = vld [vmem:[#allocation11 + $0xf0] sm:$0xff]  }
 0x2b6   :  { %1658 = vmatpush3.bf16.msra.mxu1 %v1883_v52 }
 0x2b7   :  { %1659 = vmatprep.subr.bf16.mxu1 %v1884_v54 }
 0x2ba   :  { %1660 = vmatpush3.bf16.msra.mxu1 %v1885_v56 }
 0x2bb   :  { %1661 = vmatprep.subr.bf16.mxu1 %v1886_v57 }
 0x2be   :  { %1662 = vmatpush3.bf16.msra.mxu1 %v1887_v58 }
 0x2bf   :  { %1663 = vmatprep.subr.bf16.mxu1 %v1888_v59 }
 0x2c2   :  { %1664 = vmatpush3.bf16.msra.mxu1 %v1889_v60 }
 0x2c3   :  { %1665 = vmatprep.subr.bf16.mxu1 %v1890_v61 }
 0x2c6   :  { %1666 = vmatpush3.bf16.msra.mxu1 %v1891_v62 }
 0x2c7   :  { %1667 = vmatprep.subr.bf16.mxu1 %v1892_v63 }
 0x2ca   :  { %1668 = vmatpush3.bf16.msra.mxu1 %v1893_v1 }
 0x2cb   :  { %1669 = vmatprep.subr.bf16.mxu1 %v1894_v2 }
 0x2ce   :  { %1670 = vmatpush3.bf16.msra.mxu1 %v1895_v3 }
 0x2cf   :  { %1671 = vmatprep.subr.bf16.mxu1 %v1896_v4 }
 0x2d2   :  { %1672 = vmatpush3.bf16.msra.mxu1 %v1897_v5 }
 0x2d3   :  { %1679 = vmatprep.subr.bf16.mxu1 %v1898_v6 }
 0x368   :  { %v1051_v10 = vpop.f32.mrb[4].mxu1 }
 0x369   :  { %v1052_v11 = vadd.f32 %v1051_v10, %v840_v8  ;;  %v1053_v12 = vpop.f32.mrb[5].mxu1 }
 0x36a   :  { %v1054_v13 = vadd.f32 %v1053_v12, %v844_v9  ;;  %v1055_v14 = vpop.f32.mrb[6].mxu1 }
 0x36b   :  { %v1056_v15 = vadd.f32 %v1055_v14, %v840_v8  ;;  %v1057_v16 = vpop.f32.mrb[7].mxu1  ;;  %v1103_v18 = vmax.f32 %v1052_v11, 0.0 }
 0x36c   :  { %v1058_v17 = vadd.f32 %v1057_v16, %v844_v9  ;;  %v1104_v20 = vmax.f32 %v1054_v13, 0.0 }
 0x36d   :  { %v1107_v19 = vmax.f32 %v1056_v15, 0.0 }
 0x36e   :  { %v1108_v21 = vmax.f32 %v1058_v17, 0.0 }
 0x36f   :  { %v1111_v22 = vpack.c.bf16 %v1107_v19, %v1103_v18 }
 0x370   :  { %v1112_v23 = vpack.c.bf16 %v1108_v21, %v1104_v20 }
 0x372   :  { %1403 = vmatprep.mubr.bf16.mxu1 %v1112_v23 }
 0x373   :  { %1404 = vmatmul.mubr.bf16.vlgmr.msra.gmra.mrb[12].mxu1 %v1111_v22 }
 0x374   :  { %1680 = vmatpush3.bf16.msra.mxu1 %v1899_v24 }
 0x375   :  { %1681 = vmatprep.subr.bf16.mxu1 %v1900_v25 }
 0x378   :  { %1682 = vmatpush3.bf16.msra.mxu1 %v1901_v49 }
 0x379   :  { %1683 = vmatprep.subr.bf16.mxu1 %v1902_v51 }
 0x37c   :  { %1684 = vmatpush3.bf16.msra.mxu1 %v1903_v26 }
 0x37d   :  { %1685 = vmatprep.subr.bf16.mxu1 %v1904_v27 }
 0x380   :  { %1686 = vmatpush3.bf16.msra.mxu1 %v1905_v28 }
 0x381   :  { %1687 = vmatprep.subr.bf16.mxu1 %v1906_v29 }
 0x384   :  { %1688 = vmatpush3.bf16.msra.mxu1 %v1907_v30 }
 0x385   :  { %1689 = vmatprep.subr.bf16.mxu1 %v1908_v31 }
 0x388   :  { %v1094_v36 = vpop.f32.mrb[8].mxu1  ;;  %1690 = vmatpush3.bf16.msra.mxu1 %v1909_v32 }
 0x389   :  { %v1095_v38 = vadd.f32 %v1094_v36, %v848_v33  ;;  %v1096_v39 = vpop.f32.mrb[9].mxu1  ;;  %1691 = vmatprep.subr.bf16.mxu1 %v1910_v34 }
 0x38a   :  { %v1097_v41 = vadd.f32 %v1096_v39, %v852_v35  ;;  %v1098_v42 = vpop.f32.mrb[10].mxu1 }
 0x38b   :  { %v1099_v43 = vadd.f32 %v1098_v42, %v848_v33  ;;  %v1100_v44 = vpop.f32.mrb[11].mxu1  ;;  %v1105_v46 = vmax.f32 %v1095_v38, 0.0 }
 0x38c   :  { %v1101_v45 = vadd.f32 %v1100_v44, %v852_v35  ;;  %1692 = vmatpush3.bf16.msra.mxu1 %v1911_v37  ;;  %v1106_v47 = vmax.f32 %v1097_v41, 0.0 }
 0x38d   :  { %v1109_v53 = vmax.f32 %v1099_v43, 0.0  ;;  %1693 = vmatprep.subr.bf16.mxu1 %v1912_v40 }
 0x38e   :  { %v1110_v48 = vmax.f32 %v1101_v45, 0.0 }
 0x38f   :  { %v1113_v55 = vpack.c.bf16 %v1109_v53, %v1105_v46 }
 0x390   :  { %v1114_v50 = vpack.c.bf16 %v1110_v48, %v1106_v47  ;;  %1694 = vmatpush3.bf16.msra.mxu1 %v1913_v0 }
 0x392   :  { %1444 = vmatprep.mubr.bf16.mxu1 %v1114_v50 }
 0x393   :  { %1445 = vmatmul.mubr.bf16.vlgmr.msra.gmra.mrb[16].mxu1 %v1113_v55 }
 0x394   :  { %2087 = shalt.err (!%p2084_p4)
}
 0x395   :  { %s2088_s1 = scalar_lea.hbm %s2372_s8, 512 }
 0x396   :  { %p2089_p5 = scmp.ne.s32.totalorder %s2372_s8, %s2088_s1  ;;  %p2092_p6 = scmp.lt.u32.totalorder %s2088_s1, %s2372_s8 }
 0x398   :  { %p2094_p7 = pnand %p2092_p6, %p2089_p5 }
 0x39a   :  { %2097 = shalt.err (!%p2094_p7)
}
 0x39b   :  { %1492 = dma.vmem_to_hbm [thread:$0]  %s1487_s25, 512, %s2372_s8, [#allocation16], %s2141_s0, %s2141_s0, %s2142_s14   ;;  %v129_v60 = vld [vmem:[#allocation13 + $0x3] ss:$0 sm:$0xff] }
 0x39c   :  { %s2147_s8 = smov [#allocation14]  }
 0x39d   :  { %s1474_s0 = sshll.u32 %s2147_s8, 4  ;;  %s1475_s0 = int_to_ptr.vmem [resolvable:$true] %s1474_s0 }
 0x39e   :  { %s2098_s14 = scalar_lea.vmem %s1475_s0, 128  ;;  %p2103_p9 = scmp.lt.s32.totalorder %s1475_s0, %s1475_s0 }
 0x39f   :  { %p2099_p8 = scmp.ne.s32.totalorder %s1475_s0, %s2098_s14  ;;  %p2104_p10 = scmp.lt.s32.totalorder %s2098_s14, %s2098_s14 }
 0x3a1   :  { %p2105_p11 = por %p2104_p10, %p2103_p9 }
 0x3a3   :  { %p2106_p12 = pnand %p2105_p11, %p2099_p8 }
 0x446   :  { %v1673_v52 = vpop.f32.mrb[12].mxu1 }
 0x447   :  { %v1674_v54 = vpop.f32.mrb[13].mxu1 }
 0x448   :  { %v1675_v56 = vadd.f32 %v1674_v54, %v1673_v52  ;;  %v1676_v57 = vpop.f32.mrb[14].mxu1 }
 0x449   :  { %v1677_v58 = vpop.f32.mrb[15].mxu1 }
 0x44a   :  { %v1678_v59 = vadd.f32 %v1677_v58, %v1676_v57  ;;  %v1406_v63 = vadd.f32 %v1675_v56, %v129_v60 }
 0x44c   :  { %v1409_v4 = vadd.f32 %v1678_v59, %v129_v60 }
 0x466   :  { %v1695_v61 = vpop.f32.mrb[16].mxu1 }
 0x467   :  { %v1696_v62 = vpop.f32.mrb[17].mxu1 }
 0x468   :  { %v1697_v1 = vadd.f32 %v1696_v62, %v1695_v61  ;;  %v1698_v2 = vpop.f32.mrb[18].mxu1 }
 0x469   :  { %v1699_v3 = vpop.f32.mrb[19].mxu1 }
 0x46a   :  { %v1447_v5 = vadd.f32 %v1697_v1, %v1406_v63  ;;  %v1700_v6 = vadd.f32 %v1699_v3, %v1698_v2 }
 0x46c   :  { %v1450_v7 = vadd.f32 %v1700_v6, %v1409_v4  ;;  %1918 = vtanh.f32 %v1447_v5 }
 0x46e   :  { %1920 = vtanh.f32 %v1450_v7 }
 0x476   :  { %v1919_v8 = vpop.eup %1918 }
 0x478   :  { %v1921_v9 = vpop.eup %1920 }
 0x479   :  { %v1655_v10 = vpack.c.bf16 %v1921_v9, %v1919_v8 }
 0x47b   :  { %1656 = vst [vmem:[#allocation14] sm:$0xff] %v1655_v10  }
 0x47c   :  { %2109 = shalt.err (!%p2106_p12)
}
 0x47d   :  { %s2110_s15 = scalar_lea.hbm %s2371_s7, 128 }
 0x47e   :  { %p2111_p13 = scmp.ne.s32.totalorder %s2371_s7, %s2110_s15  ;;  %p2114_p0 = scmp.lt.u32.totalorder %s2110_s15, %s2371_s7 }
 0x480   :  { %p2116_p1 = pnand %p2114_p0, %p2111_p13 }
 0x482   :  { %2119 = shalt.err (!%p2116_p1)
}
 0x483   :  { %1480 = dma.vmem_to_hbm [thread:$0]  %s1475_s0, 128, %s2371_s7, [#allocation4], %s2134_s17, %s2134_s17, %s2135_s18  }
 0x484   :  { %2128 = dma.done.wait [#allocation4], 128  }
 0x485   :  { %2129 = vsyncadd [#allocation4], 4294967168 }
 0x486   :  { %2130 = dma.done.wait [#allocation16], 512  }
 0x487   :  { %2131 = vsyncadd [#allocation16], 4294966784 }
 0x488   :  { %1499 = vsyncpa [#allocation3], 1 }
 0x489   :  { %1500 = vsyncpa [#allocation6], 1 }
 0x48a   :  { %1501 = vsyncpa [#allocation9], 1 }
 0x48b   :  { %1502 = vsyncpa [#allocation12], 1 }
 0x48c   :  { %1503 = vsyncpa [#allocation4], 1 }
 0x48d   :  { %1504 = vsyncpa [#allocation16], 1 }

</bundles_post_ra>
